<compile_context>
chip_gen: v7x
topology: tpu7x:2x2x1
jax: 0.10.0
libtpu: 0.0.40
codegen_flags: <defaults>
</compile_context>

<pallas_src>
import functools

import jax
import jax.numpy as jnp
from jax.experimental import pallas as pl
from jax.experimental.pallas import tpu as pltpu

_LANE = 128


def _round_up(v, m):
    return -(-v // m) * m


def _vmem_capacity_bytes():
    """Physical VMEM per TensorCore; conservative fallback if the query fails."""
    try:
        cap = int(pltpu.get_tpu_info().vmem_capacity_bytes)
        if cap > 0:
            return cap
    except Exception:
        pass
    return 64 * 1024 * 1024  # v7x per-TC size: safe lower bound on every gen


def _pick_batch_block(n, per_sample_bytes, budget_bytes):
    """Largest NB dividing n with NB*per_sample <= budget, keeping >=2 steps."""
    nb = max(1, min(n, budget_bytes // max(per_sample_bytes, 1)))
    if n >= 2:
        nb = min(nb, max(1, n // 2))   # keep >=2 grid steps when N allows it
    while n % nb:
        nb -= 1
    return nb


# ----------------------------------------------------------------------------
# Fused path: one kernel, whole (NB, C, HW) slab resident per grid step.
# ----------------------------------------------------------------------------
def _cse_fused_kernel(x_ref, w1s_ref, w2t_ref, o_ref):
    x = x_ref[...]                                             # (NB, C, HW) native dtype
    # AdaptiveAvgPool2d(1): channel sums; 1/HW is folded into w1s on the host.
    sums = jnp.sum(x, axis=-1, dtype=jnp.float32)              # (NB, C) f32
    # fc[0] 1x1 conv (no bias) + ReLU as a row-vector matmul.
    h = jnp.maximum(
        jnp.dot(sums, w1s_ref[...], preferred_element_type=jnp.float32), 0.0)
    # fc[2] 1x1 conv (no bias) + Sigmoid.
    s = jax.nn.sigmoid(
        jnp.dot(h, w2t_ref[...], preferred_element_type=jnp.float32))   # (NB, C)
    # Scale in native dtype (no f32 copy of the big tile).
    o_ref[...] = (x * s[:, :, None].astype(x.dtype)).astype(o_ref.dtype)


# ----------------------------------------------------------------------------
# Split path kernel 1: squeeze (pool over HW chunks + FC + sigmoid).
# ----------------------------------------------------------------------------
def _cse_squeeze_kernel(x_ref, w1s_ref, w2t_ref, s_ref, acc_ref, *,
                        hw, tile, needs_mask):
    k = pl.program_id(1)

    @pl.when(k == 0)
    def _():
        acc_ref[...] = jnp.zeros_like(acc_ref)

    x = x_ref[...]                                             # (1, C, tile)
    if needs_mask:
        lane = jax.lax.broadcasted_iota(jnp.int32, x.shape, dimension=2)
        valid = (k * tile + lane) < hw
        x = jnp.where(valid, x, jnp.zeros_like(x))
    acc_ref[...] += jnp.sum(x, axis=-1, dtype=jnp.float32)     # (1, C)

    @pl.when(k == pl.num_programs(1) - 1)
    def _():
        h = jnp.maximum(
            jnp.dot(acc_ref[...], w1s_ref[...],
                    preferred_element_type=jnp.float32), 0.0)
        s_ref[0] = jax.nn.sigmoid(
            jnp.dot(h, w2t_ref[...], preferred_element_type=jnp.float32))


# ----------------------------------------------------------------------------
# Split path kernel 2: excite (per-channel scale), fully parallel grid.
# ----------------------------------------------------------------------------
def _cse_excite_kernel(x_ref, s_ref, o_ref):
    x = x_ref[...]                                             # (1, C, tile)
    s = s_ref[0]                                               # (1, C) f32
    o_ref[...] = (x * s[:, :, None].astype(x.dtype)).astype(o_ref.dtype)


def cse_layer(x_nchw, w1, w2, *, force_split=False, hw_tile=None,
              donate_input=False):
    """x_nchw: (N, C, H, W); w1: (C//r, C); w2: (C, C//r). Matches CSELayer.forward."""
    N, C, H, W = x_nchw.shape
    HW = H * W
    Cr = w1.shape[0]
    dtype = x_nchw.dtype
    itemsize = jnp.dtype(dtype).itemsize
    inv_hw = 1.0 / float(HW)

    # Row-vector matmul orientation; fold 1/HW into the first weight so the
    # kernels feed raw channel sums straight into the MXU.
    w1s = (jnp.transpose(w1).astype(jnp.float32) * inv_hw).astype(w1.dtype)
    w2t = jnp.transpose(w2)
    w_bytes = int(w1s.size * jnp.dtype(w1s.dtype).itemsize
                  + w2t.size * jnp.dtype(w2t.dtype).itemsize)

    # Generation-aware VMEM budgets (v5e/v6e: 128 MiB, v7x: 64 MiB per TC).
    vmem_cap = _vmem_capacity_bytes()
    vmem_soft_cap = int(vmem_cap * 0.9)
    headroom = 4 << 20
    # Double-buffered input + output -> ~4 copies of the x block resident.
    block_budget = max(2 << 20,
                       (int(vmem_cap * 0.75) - 2 * w_bytes - headroom) // 4)

    # True VMEM footprint of one sample's tile (sublane/lane padded).
    sublanes = max(1, 32 // itemsize)
    c_pad = _round_up(C, sublanes)
    hw_pad = _round_up(HW, _LANE)
    per_sample_bytes = c_pad * hw_pad * itemsize

    x3 = x_nchw.reshape(N, C, HW)
    use_fused = (not force_split) and per_sample_bytes <= block_budget

    if use_fused:
        NB = _pick_batch_block(N, per_sample_bytes, block_budget)
        block_bytes = NB * per_sample_bytes
        vmem_limit = min(vmem_soft_cap,
                         max(16 << 20, 4 * block_bytes + 2 * w_bytes + headroom))
        out = pl.pallas_call(
            _cse_fused_kernel,
            out_shape=jax.ShapeDtypeStruct((N, C, HW), dtype),
            grid=(N // NB,),
            in_specs=[
                pl.BlockSpec((NB, C, HW), lambda n: (n, 0, 0)),
                pl.BlockSpec((C, Cr), lambda n: (0, 0)),
                pl.BlockSpec((Cr, C), lambda n: (0, 0)),
            ],
            out_specs=pl.BlockSpec((NB, C, HW), lambda n: (n, 0, 0)),
            input_output_aliases=({0: 0} if donate_input else {}),
            compiler_params=pltpu.CompilerParams(
                dimension_semantics=("parallel",),
                vmem_limit_bytes=int(vmem_limit)),
            cost_estimate=pl.CostEstimate(
                flops=2 * N * C * HW + 4 * N * C * Cr,
                transcendentals=N * C,
                bytes_accessed=2 * N * C * HW * itemsize + w_bytes),
        )(x3, w1s, w2t)
        return out.reshape(N, C, H, W)

    # ---- two-pass split path (a per-sample slab does not fit VMEM) ----
    if hw_tile is not None:
        tile = max(_LANE, _round_up(int(hw_tile), _LANE))
    else:
        tile = _LANE * max(1, block_budget // max(c_pad * _LANE * itemsize, 1))
    if tile >= HW:
        tile = HW            # full last dim: legal block even if HW % 128 != 0
        n_chunks = 1
    else:
        n_chunks = pl.cdiv(HW, tile)
    needs_mask = (HW % tile) != 0

    block_bytes = c_pad * _round_up(tile, _LANE) * itemsize
    vmem_limit = min(vmem_soft_cap,
                     max(16 << 20, 4 * block_bytes + 2 * w_bytes + headroom))

    # Pass 1: squeeze -> per-sample channel scales s, shape (N, 1, C).
    s = pl.pallas_call(
        functools.partial(_cse_squeeze_kernel, hw=HW, tile=tile,
                          needs_mask=needs_mask),
        out_shape=jax.ShapeDtypeStruct((N, 1, C), jnp.float32),
        grid=(N, n_chunks),
        in_specs=[
            pl.BlockSpec((1, C, tile), lambda n, k: (n, 0, k)),
            pl.BlockSpec((C, Cr), lambda n, k: (0, 0)),
            pl.BlockSpec((Cr, C), lambda n, k: (0, 0)),
        ],
        out_specs=pl.BlockSpec((1, 1, C), lambda n, k: (n, 0, 0)),
        scratch_shapes=[pltpu.VMEM((1, C), jnp.float32)],
        compiler_params=pltpu.CompilerParams(
            dimension_semantics=("parallel", "arbitrary"),
            vmem_limit_bytes=int(vmem_limit)),
        cost_estimate=pl.CostEstimate(
            flops=N * C * HW + 4 * N * C * Cr,
            transcendentals=N * C,
            bytes_accessed=N * C * HW * itemsize + w_bytes + N * C * 4),
    )(x3, w1s, w2t)

    # Pass 2: excite (scale), both grid axes parallel.
    out = pl.pallas_call(
        _cse_excite_kernel,
        out_shape=jax.ShapeDtypeStruct((N, C, HW), dtype),
        grid=(N, n_chunks),
        in_specs=[
            pl.BlockSpec((1, C, tile), lambda n, j: (n, 0, j)),
            pl.BlockSpec((1, 1, C), lambda n, j: (n, 0, 0)),
        ],
        out_specs=pl.BlockSpec((1, C, tile), lambda n, j: (n, 0, j)),
        input_output_aliases=({0: 0} if donate_input else {}),
        compiler_params=pltpu.CompilerParams(
            dimension_semantics=("parallel", "parallel"),
            vmem_limit_bytes=int(vmem_limit)),
        cost_estimate=pl.CostEstimate(
            flops=N * C * HW,
            transcendentals=0,
            bytes_accessed=2 * N * C * HW * itemsize + N * C * 4),
    )(x3, s)
    return out.reshape(N, C, H, W)


def cse_reference(x_nchw, w1, w2):
    # Pure-JAX reference matching the PyTorch forward.
    pooled = jnp.mean(x_nchw.astype(jnp.float32), axis=(2, 3))   # (N, C)
    h = jnp.maximum(pooled @ w1.T, 0.0)                          # (N, C//r)
    s = jax.nn.sigmoid(h @ w2.T)                                 # (N, C)
    return x_nchw.astype(jnp.float32) * s[:, :, None, None]


if __name__ == "__main__":
    key = jax.random.PRNGKey(0)
    kx, kw1, kw2, kx2, kx3 = jax.random.split(key, 5)
    reduction = 2

    def make_weights(k1, k2, C):
        Cr = C // reduction
        b1 = 1.0 / (C ** 0.5)
        b2 = 1.0 / (Cr ** 0.5)
        w1 = jax.random.uniform(k1, (Cr, C), jnp.float32, -b1, b1)
        w2 = jax.random.uniform(k2, (C, Cr), jnp.float32, -b2, b2)
        return w1, w2

    # Case 1: fused path, lane-aligned spatial (2, 4, 16, 16).
    x = jax.random.normal(kx, (2, 4, 16, 16), dtype=jnp.float32)
    w1, w2 = make_weights(kw1, kw2, 4)
    out = cse_layer(x, w1, w2)
    jax.block_until_ready(out)
    ref = cse_reference(x, w1, w2)
    assert out.shape == x.shape
    assert jnp.allclose(out, ref, atol=1e-5, rtol=1e-5)

    # Case 2: forced two-kernel split path, evenly divisible HW chunks.
    out_split = cse_layer(x, w1, w2, force_split=True, hw_tile=128)
    jax.block_until_ready(out_split)
    assert jnp.allclose(out_split, ref, atol=1e-5, rtol=1e-5)

    # Case 3: fused path, non-128-multiple spatial (7x7 -> no pad, full-dim block).
    xb = jax.random.normal(kx2, (2, 8, 7, 7), dtype=jnp.float32)
    w1b, w2b = make_weights(kw1, kw2, 8)
    outb = cse_layer(xb, w1b, w2b)
    jax.block_until_ready(outb)
    refb = cse_reference(xb, w1b, w2b)
    assert jnp.allclose(outb, refb, atol=1e-5, rtol=1e-5)

    # Case 4: forced split path with a ragged last HW chunk (13*13 = 128 + 41).
    xc = jax.random.normal(kx3, (2, 8, 13, 13), dtype=jnp.float32)
    outc = cse_layer(xc, w1b, w2b, force_split=True, hw_tile=128)
    jax.block_until_ready(outc)
    refc = cse_reference(xc, w1b, w2b)
    assert jnp.allclose(outc, refc, atol=1e-5, rtol=1e-5)

    # Case 5: bf16 activations (scale applied in bf16; looser tolerance).
    xbf = x.astype(jnp.bfloat16)
    outbf = cse_layer(xbf, w1, w2)
    jax.block_until_ready(outbf)
    refbf = cse_reference(xbf, w1, w2)
    assert jnp.allclose(outbf.astype(jnp.float32), refbf, atol=5e-2, rtol=5e-2)

    print("KERNEL_OK")
</pallas_src>

<mosaic_0001>
module attributes {stable_mosaic.version = 11 : i64} {
  func.func @_cse_fused_kernel(%arg0: i32, %arg1: memref<1x4x256xf32, #tpu.memory_space<vmem>>, %arg2: memref<4x2xf32, #tpu.memory_space<vmem>>, %arg3: memref<2x4xf32, #tpu.memory_space<vmem>>, %arg4: memref<1x4x256xf32, #tpu.memory_space<vmem>>) attributes {dimension_semantics = [#tpu.dimension_semantics<parallel>], iteration_bounds = array<i64: 2>, scalar_prefetch = 0 : i64, scratch_operands = 0 : i64, tpu.core_type = #tpu.core_type<tc>, window_params = [{transform_indices = @transform_0, window_bounds = array<i64: 1, 4, 256>}, {pipeline_mode = #tpu.pipeline_mode<synchronous>, transform_indices = @transform_1, window_bounds = array<i64: 4, 2>}, {pipeline_mode = #tpu.pipeline_mode<synchronous>, transform_indices = @transform_2, window_bounds = array<i64: 2, 4>}, {transform_indices = @transform_3, window_bounds = array<i64: 1, 4, 256>}]} {
    %c0 = arith.constant 0 : index
    %c0_0 = arith.constant 0 : index
    %c0_1 = arith.constant 0 : index
    %0 = vector.load %arg1[%c0, %c0_0, %c0_1] : memref<1x4x256xf32, #tpu.memory_space<vmem>>, vector<1x4x256xf32>
    %cst = arith.constant dense<0.000000e+00> : vector<1x4xf32>
    %1 = vector.multi_reduction <add>, %0, %cst [2] : vector<1x4x256xf32> to vector<1x4xf32>
    %c0_2 = arith.constant 0 : index
    %c0_3 = arith.constant 0 : index
    %2 = vector.load %arg2[%c0_2, %c0_3] : memref<4x2xf32, #tpu.memory_space<vmem>>, vector<4x2xf32>
    %cst_4 = arith.constant dense<0.000000e+00> : vector<1x2xf32>
    %3 = tpu.matmul %1, %2, %cst_4 {dimension_numbers = #tpu.dot_dimension_numbers<[1], [0], [0], [1], [0, 0, 1, 1], [], []>} : vector<1x4xf32>, vector<4x2xf32>, vector<1x2xf32> -> vector<1x2xf32>
    %cst_5 = arith.constant 0.000000e+00 : f32
    %4 = vector.broadcast %cst_5 : f32 to vector<1x2xf32>
    %5 = arith.maximumf %3, %4 : vector<1x2xf32>
    %c0_6 = arith.constant 0 : index
    %c0_7 = arith.constant 0 : index
    %6 = vector.load %arg3[%c0_6, %c0_7] : memref<2x4xf32, #tpu.memory_space<vmem>>, vector<2x4xf32>
    %cst_8 = arith.constant dense<0.000000e+00> : vector<1x4xf32>
    %7 = tpu.matmul %5, %6, %cst_8 {dimension_numbers = #tpu.dot_dimension_numbers<[1], [0], [0], [1], [0, 0, 1, 1], [], []>} : vector<1x2xf32>, vector<2x4xf32>, vector<1x4xf32> -> vector<1x4xf32>
    %8 = arith.negf %7 : vector<1x4xf32>
    %9 = math.exp %8 : vector<1x4xf32>
    %cst_9 = arith.constant 1.000000e+00 : f32
    %10 = vector.broadcast %cst_9 : f32 to vector<1x4xf32>
    %11 = arith.addf %10, %9 : vector<1x4xf32>
    %12 = arith.divf %10, %11 : vector<1x4xf32>
    %13 = vector.shape_cast %12 : vector<1x4xf32> to vector<1x4x1xf32>
    %14 = vector.broadcast %13 : vector<1x4x1xf32> to vector<1x4x256xf32>
    %15 = arith.mulf %0, %14 : vector<1x4x256xf32>
    %c0_10 = arith.constant 0 : index
    %c0_11 = arith.constant 0 : index
    %c0_12 = arith.constant 0 : index
    %16 = vector.load %arg4[%c0_10, %c0_11, %c0_12] : memref<1x4x256xf32, #tpu.memory_space<vmem>>, vector<1x4x256xf32>
    tpu.vector_store %arg4[%c0_10, %c0_11, %c0_12], %15 {strides = array<i32>} : memref<1x4x256xf32, #tpu.memory_space<vmem>>, vector<1x4x256xf32>,
    return
  }
  func.func @transform_0(%arg0: i32) -> (i32, i32, i32) {
    %c0_i32 = arith.constant 0 : i32
    %c0_i32_0 = arith.constant 0 : i32
    %c0_i32_1 = arith.constant 0 : i32
    return %arg0, %c0_i32, %c0_i32_0 : i32, i32, i32
  }
  func.func @transform_1(%arg0: i32) -> (i32, i32) {
    %c0_i32 = arith.constant 0 : i32
    %c0_i32_0 = arith.constant 0 : i32
    %c0_i32_1 = arith.constant 0 : i32
    return %c0_i32, %c0_i32_0 : i32, i32
  }
  func.func @transform_2(%arg0: i32) -> (i32, i32) {
    %c0_i32 = arith.constant 0 : i32
    %c0_i32_0 = arith.constant 0 : i32
    %c0_i32_1 = arith.constant 0 : i32
    return %c0_i32, %c0_i32_0 : i32, i32
  }
  func.func @transform_3(%arg0: i32) -> (i32, i32, i32) {
    %c0_i32 = arith.constant 0 : i32
    %c0_i32_0 = arith.constant 0 : i32
    %c0_i32_1 = arith.constant 0 : i32
    return %arg0, %c0_i32, %c0_i32_0 : i32, i32, i32
  }
}

</mosaic_0001>

<bundles_post_ra>
// kernel: tpu_custom_call.1
= control target key start
LH: loop header
LB: loop body
LE: loop exit
PB: predicated region body
PF: predicated region fallthrough
CT: control target
= control target key end

     0   :  { %8 = vsyncpa [#allocation3], 0  ;;  %s853_s0 = inlined_call_operand.hbm [shape: f32[2,4,256], index: 0, kind: input, shape index: {}]   ;;  %s854_s1 = inlined_call_operand.vmem [shape: f32[4,2], index: 1, kind: input, shape index: {}]   ;;  %s855_s2 = inlined_call_operand.vmem [shape: f32[2,4], index: 2, kind: input, shape index: {}]   ;;  %s856_s3 = inlined_call_operand.hbm [shape: f32[2,4,256], index: 3, kind: output, shape index: {}]  }
   0x1   :  { %10 = vsyncpa [#allocation3 + $0x1], 0 }
   0x2   :  { %11 = vsyncpa [#allocation4], 0 }
   0x3   :  { %13 = vsyncpa [#allocation4 + $0x1], 0  ;;  %s682_s12 = smov 0   ;;  %s684_s13 = smov 0  }
   0x4   :  { %s686_s14 = smov 0   ;;  %s688_s15 = smov 0  }
   0x5 LB: > { %s703_s16 = sadd.s32 4294967295, %s655_s15   ;;  %s470_s17 = sadd.s32 4294967294, %s655_s15   ;;  %s655_s15 = sphi %s688_s15, %s871_s15   ;;  %s651_s14 = sphi %s686_s14, %s870_s14   ;;  %s647_s13 = sphi %s684_s13, %s869_s13   ;;  %s643_s12 = sphi %s682_s12, %s868_s12  }
   0x6   : > { %s707_s18 = sadd.s32 1, %s655_s15   ;;  %s26_s19 = sadd.s32 1, %s651_s14 }
   0x7   : > { %s23_s20 = ssub.s32 %s655_s15, %s707_s18  ;;  %p33_p0 = scmp.ne.s32.totalorder %s651_s14, %s647_s13 }
   0x8   : > { %p24_p1 = scmp.eq.s32.totalorder %s23_s20, 0  ;;  %p34_p2 = scmp.eq.s32.totalorder %s655_s15, 0 }
   0x9   : > { %p39_p3 = scmp.ne.s32.totalorder %s647_s13, %s643_s12  ;;  %p40_p4 = scmp.eq.s32.totalorder %s703_s16, 0 }
   0xa   : > { %s719_s21 = scalar_select %p24_p1, %s651_s14, %s26_s19  }
   0xb   : > { %p721_p5 = por %p34_p2, %p33_p0  ;;  %p725_p6 = por %p40_p4, %p39_p3 }
   0xc   : > { %p105_p7 = scmp.eq.s32.totalorder %s703_s16, 1  ;;  %p111_p8 = scmp.eq.s32.totalorder %s470_s17, 1 }
   0xd   : > { %p517_p10 = scmp.lt.s32.totalorder %s655_s15, 2  ;;  %s137_s26 = sand.u32 1, %s651_s14  }
   0xe   : > { %p732_p11 = por %p105_p7, %p33_p0  ;;  %p736_p12 = por %p111_p8, %p39_p3 }
   0xf   : > { %s489_s27 = sshll.u32 %s655_s15, 7  ;;  %s473_s28 = sshll.u32 %s137_s26, 3 }
  0x10   : > { %s860_s24 = scalar_select %p732_p11, 1, 0 }
  0x11   : > { %s861_s25 = scalar_select %p736_p12, 1, 0 }
  0x12   : > { %s745_s4 = scalar_lea.hbm %s853_s0, %s489_s27  ;;  %s141_s5 = scalar_lea.vmem [#allocation2], %s473_s28 }
  0x13   : > { %s149_s6 = sshll.u32 %s141_s5, 4  ;;  %p749_p13 = pnand %p517_p10, %p721_p5  ;;  %s753_s6 = int_to_ptr.vmem [resolvable:$true] %s149_s6 }
  0x14   : > { %s138_s8 = scalar_lea.sflag [#allocation3], %s137_s26  ;;  %s559_s9 = scalar_lea.hbm %s745_s4, 128 }
  0x15   : > { %p560_p2 = scmp.ne.s32.totalorder %s745_s4, %s559_s9  ;;  %p561_p3 = pneg %p749_p13 }
  0x16   : > { %s564_s17 = scalar_lea.hbm %s853_s0, 256  ;;  %p565_p5 = scmp.lt.u32.totalorder %s745_s4, %s853_s0 }
  0x17   : > { %p562_p4 = pnand %p561_p3, %p560_p2  ;;  %p566_p8 = scmp.lt.u32.totalorder %s564_s17, %s559_s9 }
  0x18   : > { %p568_p9 = scmp.lt.u32.totalorder %s559_s9, %s745_s4 }
  0x19   : > { %p563_p7 = pneg %p562_p4  ;;  %p567_p10 = por %p566_p8, %p565_p5 }
  0x1b   : > { %p569_p0 = por %p568_p9, %p567_p10 }
  0x1d   : > { %p570_p1 = pnand %p569_p0, %p563_p7 }
  0x1f   : > { %573 = shalt.err (!%p570_p1)
}
  0x20   : > { %s574_s22 = scalar_lea.vmem %s753_s6, 128  ;;  %s657_s26 = smov [#allocation2]  }
  0x21   : > { %p575_p2 = scmp.ne.s32.totalorder %s753_s6, %s574_s22  ;;  %s579_s27 = sshll.u32 %s657_s26, 4  ;;  %s580_s27 = int_to_ptr.vmem [resolvable:$false] %s579_s27 }
  0x22   : > { %s581_s28 = scalar_lea.vmem %s580_s27, 256  ;;  %p582_p11 = scmp.lt.s32.totalorder %s753_s6, %s580_s27 }
  0x23   : > { %p577_p4 = pnand %p575_p2, %p561_p3  ;;  %p583_p5 = scmp.lt.s32.totalorder %s581_s28, %s574_s22 }
  0x25   : > { %p578_p12 = pneg %p577_p4  ;;  %p584_p8 = por %p583_p5, %p582_p11 }
  0x27   : > { %p585_p9 = pnand %p584_p8, %p578_p12 }
  0x29   : > { %588 = shalt.err (!%p585_p9)
}
  0x2a   : > { %512 = dma.hbm_to_vmem [thread:$0]  (!%p749_p13), %s745_s4, 128, %s753_s6, %s138_s8  }
  0x2b   : > { %p863_p0 = scmp.lt.s32.totalorder %s655_s15, 3  ;;  %p864_p1 = scmp.ge.s32.totalorder %s655_s15, 1 }
  0x2d   : > { %p155_p3 = pnand %p864_p1, %p863_p0 }
  0x2e   : > { %s787_s29 = sand.u32 (!%p155_p3), 1, %s647_s13  }
  0x2f   : > { %158 = sbr.rel (%p155_p3) target bundleno = 792 (0x318), region = 32  ;;  %s477_s30 = sshll.u32 (!%p155_p3), %s787_s29, 3 }
  0x30   : > { %s161_s5 = scalar_lea.sflag (!%p155_p3), [#allocation3], %s787_s29  ;;  %s164_s7 = scalar_lea.vmem (!%p155_p3), [#allocation2], %s477_s30 }
  0x36   : > { %634 = dma.done.wait (%p725_p6), %s161_s5, 128  }
  0x37   : > { %636 = vsyncadd (%p725_p6), %s161_s5, 4294967168  ;;  %vm191_vm0 = vcmask 1043456   ;;  %v187_v0 = vld [vmem:[%s164_s7] sm:$0xff]  ;;  %v658_v5 = vmov 0.0   ;;  %vm659_vm1 = vmmov 0   ;;  %v199_v7 = vlaneseq  ;;  %s490_s9 = sshll.u32 %s703_s16, 7 }
  0x38   : > { %v189_v1 = vcombine.high %v187_v0, %v187_v0  ;;  %v192_v2 = vsel %vm191_vm0, %v187_v0, 0.0  ;;  %495 = vmatprep.subr.mxu0 %v658_v5  ;;  %v197_v6 = vld [vmem:[%s854_s1] sm:$0xf]  ;;  %500 = vmatprep.subr.mxu1 %v658_v5  ;;  %vm205_vm2 = vcmask 31744   ;;  %vm287_vm3 = vcmask 1041408   ;;  %s186_s10 = scalar_lea.vmem [#allocation5], %s477_s30  ;;  %s809_s20 = scalar_lea.hbm %s856_s3, %s490_s9 }
  0x39   : > { %496 = vmatpush3.msk.msra.mxu0 %vm191_vm0, %v197_v6  ;;  %497 = vmatprep.mubr.msk.f32.mxu0 %vm659_vm1, %v658_v5  ;;  %v200_v8 = vand.u32 127, %v199_v7  ;;  %v202_v9 = vshrl.u32 %v199_v7, 7  ;;  %v282_v13 = vld [vmem:[%s855_s2] sm:$0x3]  ;;  %vm283_vm4 = vcmask 15360   ;;  %s400_s11 = sshll.u32 %s186_s10, 4  ;;  %s811_s11 = int_to_ptr.vmem [resolvable:$true] %s400_s11 }
  0x3a   : > { %v193_v3 = vsel %vm191_vm0, %v189_v1, 0.0  ;;  %502 = vmatprep.mubr.msk.f32.mxu1 %vm659_vm1, %v658_v5  ;;  %501 = vmatpush3.msk.msra.mxu1 %vm287_vm3, %v282_v13  ;;  %v660_v25 = vmov 839922192   ;;  %s386_s22 = scalar_lea.sflag [#allocation4], %s787_s29  ;;  %s589_s26 = scalar_lea.vmem %s811_s11, 128 }
  0x3b   : > { %v194_v4 = vadd.f32 %v193_v3, %v192_v2  ;;  %v203_v10 = vsub.s32 %v200_v8, %v202_v9  ;;  %v369_v22 = vsub.s32 0, %v202_v9  ;;  %v376_v26 = vunpack.c.l.s4 %v660_v25  ;;  %p590_p6 = scmp.ne.s32.totalorder %s811_s11, %s589_s26  ;;  %p865_p11 = scmp.ne.s32.totalorder %s860_s24, 0 }
  0x3c   : > { %s661_s16 = smov [#allocation5]  }
  0x3d   : > { %195 = vadd.xlane.f32.xlu0 %v194_v4  ;;  %v377_v27 = vunpack.c.0.s8 %v376_v26  ;;  %p591_p12 = pnand %p590_p6, %p865_p11  ;;  %s593_s27 = sshll.u32 %s661_s16, 4  ;;  %s594_s27 = int_to_ptr.vmem [resolvable:$false] %s593_s27 }
  0x3e   : > { %s595_s28 = scalar_lea.vmem %s594_s27, 256  ;;  %p596_p7 = scmp.lt.s32.totalorder %s811_s11, %s594_s27 }
  0x3f   : > { %v380_v28 = vsub.s32 %v377_v27, %v202_v9  ;;  %p592_p13 = pneg %p591_p12  ;;  %p597_p10 = scmp.lt.s32.totalorder %s595_s28, %s589_s26 }
  0x41   : > { %p598_p2 = por %p597_p10, %p596_p7 }
  0x43   : > { %p599_p4 = pnand %p598_p2, %p592_p13 }
  0xca   : > { %v196_v11 = vpop.xlane.xlu0 %195 }
  0xcb   : > { %v204_v12 = vrot.slane %v196_v11, %v203_v10 }
  0xcd   : > { %498 = vmatmul.mubr.msk.f32.vlgmr.msra.gmra.mrb[0].mxu0 %vm205_vm2, %v204_v12 }
 0x1a0   : > { %v277_v14 = vpop.f32.mrb[0].mxu0 }
 0x1a1   : > { %v281_v15 = vmax.f32 %v277_v14, 0.0  ;;  %v499_v16 = vpop.f32.mrb[1].mxu0 }
 0x1a3   : > { %503 = vmatmul.mubr.msk.f32.vlgmr.msra.gmra.mrb[0].mxu1 %vm283_vm4, %v281_v15 }
 0x276   : > { %v357_v17 = vpop.f32.mrb[0].mxu1 }
 0x277   : > { %v483_v18 = vmul.f32 -1.442695, %v357_v17  ;;  %v504_v19 = vpop.f32.mrb[1].mxu1 }
 0x279   : > { %555 = vpow2.f32 %v483_v18 }
 0x283   : > { %v556_v20 = vpop.eup %555 }
 0x284   : > { %v364_v21 = vadd.f32 1.0, %v556_v20 }
 0x286   : > { %557 = vrcp.f32 %v364_v21 }
 0x290   : > { %v558_v23 = vpop.eup %557 }
 0x291   : > { %v370_v24 = vrot.slane %v558_v23, %v369_v22 }
 0x293   : > { %372 = vbcast.lane.b32.xlu0 %v370_v24, 256 }
 0x305   : > { %v373_v29 = vpop.permute.xlu0 %372 }
 0x306   : > { %v381_v30 = vrot.slane %v373_v29, %v380_v28 }
 0x308   : > { %v383_v31 = vmul.f32 %v381_v30, %v187_v0 }
 0x30a   : > { %384 = vst [vmem:[%s186_s10] sm:$0xff] %v383_v31 }
 0x30b   : > { %602 = shalt.err (!%p599_p4)
}
 0x30c   : > { %s603_s29 = scalar_lea.hbm %s809_s20, 128  ;;  %s607_s7 = scalar_lea.hbm %s856_s3, 256 }
 0x30d   : > { %p604_p5 = scmp.ne.s32.totalorder %s809_s20, %s603_s29  ;;  %p608_p0 = scmp.lt.u32.totalorder %s809_s20, %s856_s3 }
 0x30e   : > { %p609_p1 = scmp.lt.u32.totalorder %s607_s7, %s603_s29  ;;  %p611_p6 = scmp.lt.u32.totalorder %s603_s29, %s809_s20 }
 0x30f   : > { %p605_p8 = pnand %p604_p5, %p865_p11 }
 0x310   : > { %p610_p3 = por %p609_p1, %p608_p0 }
 0x311   : > { %p606_p9 = pneg %p605_p8 }
 0x312   : > { %p612_p12 = por %p611_p6, %p610_p3 }
 0x314   : > { %p613_p13 = pnand %p612_p12, %p606_p9 }
 0x316   : > { %616 = shalt.err (!%p613_p13)
}
 0x317   : > { %507 = dma.vmem_to_hbm [thread:$0]  (%p865_p11), %s811_s11, 128, %s809_s20, %s386_s22  }
 0x318 PF: > { %s412_s23 = sand.u32 1, %s643_s12   ;;  %p866_p7 = scmp.ne.s32.totalorder %s861_s25, 0 }
 0x319   : > { %p867_p10 = scmp.ge.s32.totalorder %s655_s15, 2  ;;  %s413_s8 = scalar_lea.sflag [#allocation4], %s412_s23 }
 0x31b   : > { %p514_p2 = pnand %p867_p10, %p866_p7 }
 0x31d   : > { %638 = dma.done.wait (!%p514_p2), %s413_s8, 128  }
 0x31e   : > { %640 = vsyncadd (!%p514_p2), %s413_s8, 4294967168  ;;  %p16_p4 = scmp.ge.s32.totalorder %s707_s18, 4   ;;  %s868_s12 = smov %s647_s13 }
 0x31f   : > { %s869_s13 = smov %s651_s14  ;;  %s870_s14 = smov %s719_s21 }
 0x320   : > { %s871_s15 = smov %s707_s18  ;;  %18 = sbr.rel (!%p16_p4) target bundleno = 5 (0x5), region = 77 }
 0x327   :  { %418 = vsyncpa [#allocation3], 1 }
 0x328   :  { %420 = vsyncpa [#allocation3 + $0x1], 1 }
 0x329   :  { %421 = vsyncpa [#allocation4], 1 }
 0x32a   :  { %423 = vsyncpa [#allocation4 + $0x1], 1 }

</bundles_post_ra>
